<compile_context>
chip_gen: v5e
topology: v5e:2x2
jax: 0.10.0
libtpu: 0.0.40
codegen_flags: <defaults>
</compile_context>

<pallas_src>
import jax
import jax.numpy as jnp
import numpy as np
from jax.experimental import pallas as pl
from jax.experimental.pallas import tpu as pltpu


def _round_up(x: int, m: int) -> int:
    return (x + m - 1) // m * m


def _ocwcce_kernel(logits_ref, tgt_ref, sum_ref):
    """One (time-tile, batch-tile) grid step.

    logits_ref: (t_tile, C, sub_tile, 128)  storage dtype (f32/bf16)
    tgt_ref:    (t_tile, 1, sub_tile, 128)  int8 class labels; -1 == padded row
    sum_ref:    (t_tile, 1, 1, 128)         f32 per-lane partial CCE sums
    """
    t_tile = logits_ref.shape[0]
    num_classes = logits_ref.shape[1]                        # static (C = 3)

    for tt in range(t_tile):                                 # static unroll
        tgt = tgt_ref[tt, 0].astype(jnp.int32)               # (sub_tile, 128)
        valid = tgt >= 0

        # Per-class 2-D tiles; mask padded rows to 0 so -inf never enters math.
        rows = []
        for c in range(num_classes):
            xc = logits_ref[tt, c].astype(jnp.float32)       # f32 compute (v5e-safe)
            rows.append(jnp.where(valid, xc, 0.0))

        # Unrolled class max (pure VPU maximum ops, no cross-lane reduce).
        m = rows[0]
        for c in range(1, num_classes):
            m = jnp.maximum(m, rows[c])

        # Unrolled sum of exp for the log-sum-exp denominator (EUP exp + VPU add).
        denom = jnp.exp(rows[0] - m)
        for c in range(1, num_classes):
            denom = denom + jnp.exp(rows[c] - m)

        # Gather the target-class logit with an unrolled select chain.
        tgt_logit = rows[0]
        for c in range(1, num_classes):
            tgt_logit = jnp.where(tgt == c, rows[c], tgt_logit)

        # -log softmax(x)[target] == logsumexp(x) - x[target]
        cce = (m + jnp.log(denom)) - tgt_logit               # (sub_tile, 128)
        cce = jnp.where(valid, cce, 0.0)

        # Reduce sublanes only (XLU); lanes are reduced in the JAX epilogue.
        sum_ref[tt, 0] = jnp.sum(cce, axis=0, keepdims=True)  # (1, 128) lane-dense


def ocwcce_loss(logits, targets, *, t_tile: int | None = None,
                max_sub_tile: int = 256):
    """Forward pass of OCWCCE.

    logits:  (B, T, C) float (f32 or bf16); padded timesteps are -inf rows.
    targets: (B, T) float class labels; padded entries are -inf.
    Returns the scalar f32 loss, matching the PyTorch module's forward (whose
    ordinal / class weights are overridden in the reference and thus inert).
    """
    B, T, C = logits.shape

    # Validity + int8 targets derived once in the wrapper (tiny arrays).
    valid = jnp.isfinite(targets)                                   # (B, T)
    tgt_i8 = jnp.where(valid, targets, -1.0).astype(jnp.int8)       # (B, T)

    # --- batch tiling: (sub, 128) so the batch fills sublanes AND lanes -----
    b_pad = _round_up(B, 128)
    sub = b_pad // 128
    if sub <= max_sub_tile:
        sub_tile = sub                                  # full dim -> always legal
        nb = 1
    else:
        sub_tile = max_sub_tile                         # multiple of 32 (int8-safe)
        sub = _round_up(sub, sub_tile)
        nb = sub // sub_tile
        b_pad = sub * 128

    # --- time tiling: fold several timepoints per grid step -----------------
    if t_tile is None:
        t_tile = min(T, 8)
        if nb == 1 and T > 1:
            # keep >= 2 parallel grid iterations so both v7x TCs get work
            t_tile = min(t_tile, pl.cdiv(T, 2))
    t_tile = max(1, min(t_tile, T))
    T_pad = _round_up(T, t_tile)
    nt = T_pad // t_tile

    # (T_pad, C, sub, 128): batch on (sublane, lane).  Storage dtype preserved.
    lg = jnp.transpose(logits, (1, 2, 0))                           # (T, C, B)
    lg = jnp.pad(lg, ((0, T_pad - T), (0, 0), (0, b_pad - B)))
    lg = lg.reshape(T_pad, C, sub, 128)

    tg = jnp.transpose(tgt_i8, (1, 0)).reshape(T, 1, B)             # (T, 1, B)
    tg = jnp.pad(tg, ((0, T_pad - T), (0, 0), (0, b_pad - B)),
                 constant_values=-1)
    tg = tg.reshape(T_pad, 1, sub, 128)

    dtype_bytes = jnp.dtype(logits.dtype).itemsize
    cost = pl.CostEstimate(
        flops=15 * B * T,
        transcendentals=4 * B * T,                                  # 3 exp + 1 log
        bytes_accessed=(T_pad * C * b_pad * dtype_bytes             # logits
                        + T_pad * b_pad                             # int8 targets
                        + T_pad * nb * 128 * 4),                    # partial sums
    )

    partial = pl.pallas_call(
        _ocwcce_kernel,
        out_shape=jax.ShapeDtypeStruct((T_pad, nb, 1, 128), jnp.float32),
        grid=(nt, nb),
        in_specs=[
            pl.BlockSpec((t_tile, C, sub_tile, 128), lambda t, b: (t, 0, b, 0)),
            pl.BlockSpec((t_tile, 1, sub_tile, 128), lambda t, b: (t, 0, b, 0)),
        ],
        out_specs=pl.BlockSpec((t_tile, 1, 1, 128), lambda t, b: (t, b, 0, 0)),
        compiler_params=pltpu.CompilerParams(
            dimension_semantics=("parallel", "parallel"),
            vmem_limit_bytes=32 * 1024 * 1024,
        ),
        cost_estimate=cost,
    )(lg, tg)

    # Tiny epilogue in JAX: cross-tile/lane reduce, per-T divide, mean over T.
    # (Ordinal / class weights from the module are dead code -- see header note.)
    sum_t = jnp.sum(partial[:T, :, 0, :], axis=(1, 2))              # (T,)
    cnt_t = jnp.sum(valid, axis=0).astype(jnp.float32)              # (T,)
    # Guard against an all-padded timepoint (the torch reference would NaN).
    per_t = jnp.where(cnt_t > 0, sum_t / jnp.maximum(cnt_t, 1.0), 0.0)
    return jnp.sum(per_t) / T


def _reference_loss(logits_np, targets_np):
    """Pure-numpy reference mirroring the PyTorch forward semantics."""
    _, T, _ = logits_np.shape
    total = 0.0
    for t in range(T):
        mask = np.isfinite(targets_np[:, t])
        lt = logits_np[mask, t, :].astype(np.float64)
        yt = targets_np[mask, t].astype(np.int64)
        m = lt.max(axis=-1, keepdims=True)
        lse = m[:, 0] + np.log(np.exp(lt - m).sum(axis=-1))
        total += float(np.mean(lse - lt[np.arange(len(yt)), yt]))
    return total / T


if __name__ == "__main__":
    key = jax.random.PRNGKey(0)
    k1, k2, k3, k4, k5 = jax.random.split(key, 5)

    loss_fn = jax.jit(ocwcce_loss, static_argnames=("t_tile", "max_sub_tile"))

    # --- small f32 case (B=6, T=4, C=3), variable sequence lengths -----------
    B, T, C = 6, 4, 3
    logits = jax.random.normal(k1, (B, T, C), dtype=jnp.float32)
    targets = jax.random.randint(k2, (B, T), 0, C).astype(jnp.float32)
    lengths = jnp.array([4, 3, 2, 4, 1, 3])
    pad = jnp.arange(T)[None, :] >= lengths[:, None]                # (B, T)
    logits = jnp.where(pad[:, :, None], -jnp.inf, logits)
    targets = jnp.where(pad, -jnp.inf, targets)

    loss = jax.block_until_ready(loss_fn(logits, targets))
    ref = _reference_loss(np.asarray(logits), np.asarray(targets))
    assert np.allclose(float(loss), ref, rtol=1e-5, atol=1e-5), (float(loss), ref)

    # --- larger bf16 case: multiple sublanes, non-divisible T, padded batch --
    B2, T2 = 200, 5
    logits2 = jax.random.normal(k3, (B2, T2, C), dtype=jnp.float32)
    targets2 = jax.random.randint(k4, (B2, T2), 0, C).astype(jnp.float32)
    lengths2 = jax.random.randint(k5, (B2,), 1, T2 + 1).at[0].set(T2)
    pad2 = jnp.arange(T2)[None, :] >= lengths2[:, None]
    logits2 = jnp.where(pad2[:, :, None], -jnp.inf, logits2).astype(jnp.bfloat16)
    targets2 = jnp.where(pad2, -jnp.inf, targets2)

    loss2 = jax.block_until_ready(loss_fn(logits2, targets2))
    ref2 = _reference_loss(np.asarray(logits2.astype(jnp.float32)),
                           np.asarray(targets2))
    assert np.allclose(float(loss2), ref2, rtol=1e-4, atol=1e-4), (float(loss2), ref2)

    # --- explicit t_tile=1 (old behaviour) still correct ---------------------
    loss3 = jax.block_until_ready(loss_fn(logits2, targets2, t_tile=1))
    assert np.allclose(float(loss3), ref2, rtol=1e-4, atol=1e-4), (float(loss3), ref2)

    print("KERNEL_OK")
</pallas_src>

<mosaic_0001>
module attributes {stable_mosaic.version = 11 : i64} {
  func.func @_ocwcce_kernel(%arg0: i32, %arg1: i32, %arg2: memref<2x3x1x128xf32, #tpu.memory_space<vmem>>, %arg3: memref<2x1x1x128xi8, #tpu.memory_space<vmem>>, %arg4: memref<2x1x1x128xf32, #tpu.memory_space<vmem>>) attributes {dimension_semantics = [#tpu.dimension_semantics<parallel>, #tpu.dimension_semantics<parallel>], iteration_bounds = array<i64: 2, 1>, scalar_prefetch = 0 : i64, scratch_operands = 0 : i64, tpu.core_type = #tpu.core_type<tc>, window_params = [{transform_indices = @transform_0, window_bounds = array<i64: 2, 3, 1, 128>}, {transform_indices = @transform_1, window_bounds = array<i64: 2, 1, 1, 128>}, {transform_indices = @transform_2, window_bounds = array<i64: 2, 1, 1, 128>}]} {
    %c0 = arith.constant 0 : index
    %c0_0 = arith.constant 0 : index
    %c0_1 = arith.constant 0 : index
    %c0_2 = arith.constant 0 : index
    %0 = vector.load %arg3[%c0, %c0_0, %c0_1, %c0_2] : memref<2x1x1x128xi8, #tpu.memory_space<vmem>>, vector<1x1x1x128xi8>
    %1 = vector.shape_cast %0 : vector<1x1x1x128xi8> to vector<1x128xi8>
    %2 = arith.extsi %1 : vector<1x128xi8> to vector<1x128xi32>
    %c0_i32 = arith.constant 0 : i32
    %3 = vector.broadcast %c0_i32 : i32 to vector<1x128xi32>
    %4 = arith.cmpi sge, %2, %3 : vector<1x128xi32>
    %c0_3 = arith.constant 0 : index
    %c0_4 = arith.constant 0 : index
    %c0_5 = arith.constant 0 : index
    %c0_6 = arith.constant 0 : index
    %5 = vector.load %arg2[%c0_3, %c0_4, %c0_5, %c0_6] : memref<2x3x1x128xf32, #tpu.memory_space<vmem>>, vector<1x1x1x128xf32>
    %6 = vector.shape_cast %5 : vector<1x1x1x128xf32> to vector<1x128xf32>
    %cst = arith.constant 0.000000e+00 : f32
    %7 = vector.broadcast %cst : f32 to vector<1x128xf32>
    %8 = arith.select %4, %6, %7 : vector<1x128xi1>, vector<1x128xf32>
    %c0_7 = arith.constant 0 : index
    %c1 = arith.constant 1 : index
    %c0_8 = arith.constant 0 : index
    %c0_9 = arith.constant 0 : index
    %9 = vector.load %arg2[%c0_7, %c1, %c0_8, %c0_9] : memref<2x3x1x128xf32, #tpu.memory_space<vmem>>, vector<1x1x1x128xf32>
    %10 = vector.shape_cast %9 : vector<1x1x1x128xf32> to vector<1x128xf32>
    %cst_10 = arith.constant 0.000000e+00 : f32
    %11 = vector.broadcast %cst_10 : f32 to vector<1x128xf32>
    %12 = arith.select %4, %10, %11 : vector<1x128xi1>, vector<1x128xf32>
    %c0_11 = arith.constant 0 : index
    %c2 = arith.constant 2 : index
    %c0_12 = arith.constant 0 : index
    %c0_13 = arith.constant 0 : index
    %13 = vector.load %arg2[%c0_11, %c2, %c0_12, %c0_13] : memref<2x3x1x128xf32, #tpu.memory_space<vmem>>, vector<1x1x1x128xf32>
    %14 = vector.shape_cast %13 : vector<1x1x1x128xf32> to vector<1x128xf32>
    %cst_14 = arith.constant 0.000000e+00 : f32
    %15 = vector.broadcast %cst_14 : f32 to vector<1x128xf32>
    %16 = arith.select %4, %14, %15 : vector<1x128xi1>, vector<1x128xf32>
    %17 = arith.maximumf %8, %12 : vector<1x128xf32>
    %18 = arith.maximumf %17, %16 : vector<1x128xf32>
    %19 = arith.subf %8, %18 : vector<1x128xf32>
    %20 = math.exp %19 : vector<1x128xf32>
    %21 = arith.subf %12, %18 : vector<1x128xf32>
    %22 = math.exp %21 : vector<1x128xf32>
    %23 = arith.addf %20, %22 : vector<1x128xf32>
    %24 = arith.subf %16, %18 : vector<1x128xf32>
    %25 = math.exp %24 : vector<1x128xf32>
    %26 = arith.addf %23, %25 : vector<1x128xf32>
    %c1_i32 = arith.constant 1 : i32
    %27 = vector.broadcast %c1_i32 : i32 to vector<1x128xi32>
    %28 = arith.cmpi eq, %2, %27 : vector<1x128xi32>
    %29 = arith.select %28, %12, %8 : vector<1x128xi1>, vector<1x128xf32>
    %c2_i32 = arith.constant 2 : i32
    %30 = vector.broadcast %c2_i32 : i32 to vector<1x128xi32>
    %31 = arith.cmpi eq, %2, %30 : vector<1x128xi32>
    %32 = arith.select %31, %16, %29 : vector<1x128xi1>, vector<1x128xf32>
    %33 = math.log %26 : vector<1x128xf32>
    %34 = arith.addf %18, %33 : vector<1x128xf32>
    %35 = arith.subf %34, %32 : vector<1x128xf32>
    %cst_15 = arith.constant 0.000000e+00 : f32
    %36 = vector.broadcast %cst_15 : f32 to vector<1x128xf32>
    %37 = arith.select %4, %35, %36 : vector<1x128xi1>, vector<1x128xf32>
    %cst_16 = arith.constant dense<0.000000e+00> : vector<128xf32>
    %38 = vector.multi_reduction <add>, %37, %cst_16 [0] : vector<1x128xf32> to vector<128xf32>
    %39 = vector.shape_cast %38 : vector<128xf32> to vector<1x128xf32>
    %c0_17 = arith.constant 0 : index
    %c0_18 = arith.constant 0 : index
    %c0_19 = arith.constant 0 : index
    %c0_20 = arith.constant 0 : index
    %40 = vector.load %arg4[%c0_17, %c0_18, %c0_19, %c0_20] : memref<2x1x1x128xf32, #tpu.memory_space<vmem>>, vector<1x1x1x128xf32>
    %41 = vector.shape_cast %40 : vector<1x1x1x128xf32> to vector<1x128xf32>
    %42 = vector.shape_cast %39 : vector<1x128xf32> to vector<1x1x1x128xf32>
    tpu.vector_store %arg4[%c0_17, %c0_18, %c0_19, %c0_20], %42 {strides = array<i32>} : memref<2x1x1x128xf32, #tpu.memory_space<vmem>>, vector<1x1x1x128xf32>,
    %c1_21 = arith.constant 1 : index
    %c0_22 = arith.constant 0 : index
    %c0_23 = arith.constant 0 : index
    %c0_24 = arith.constant 0 : index
    %43 = vector.load %arg3[%c1_21, %c0_22, %c0_23, %c0_24] : memref<2x1x1x128xi8, #tpu.memory_space<vmem>>, vector<1x1x1x128xi8>
    %44 = vector.shape_cast %43 : vector<1x1x1x128xi8> to vector<1x128xi8>
    %45 = arith.extsi %44 : vector<1x128xi8> to vector<1x128xi32>
    %c0_i32_25 = arith.constant 0 : i32
    %46 = vector.broadcast %c0_i32_25 : i32 to vector<1x128xi32>
    %47 = arith.cmpi sge, %45, %46 : vector<1x128xi32>
    %c1_26 = arith.constant 1 : index
    %c0_27 = arith.constant 0 : index
    %c0_28 = arith.constant 0 : index
    %c0_29 = arith.constant 0 : index
    %48 = vector.load %arg2[%c1_26, %c0_27, %c0_28, %c0_29] : memref<2x3x1x128xf32, #tpu.memory_space<vmem>>, vector<1x1x1x128xf32>
    %49 = vector.shape_cast %48 : vector<1x1x1x128xf32> to vector<1x128xf32>
    %cst_30 = arith.constant 0.000000e+00 : f32
    %50 = vector.broadcast %cst_30 : f32 to vector<1x128xf32>
    %51 = arith.select %47, %49, %50 : vector<1x128xi1>, vector<1x128xf32>
    %c1_31 = arith.constant 1 : index
    %c1_32 = arith.constant 1 : index
    %c0_33 = arith.constant 0 : index
    %c0_34 = arith.constant 0 : index
    %52 = vector.load %arg2[%c1_31, %c1_32, %c0_33, %c0_34] : memref<2x3x1x128xf32, #tpu.memory_space<vmem>>, vector<1x1x1x128xf32>
    %53 = vector.shape_cast %52 : vector<1x1x1x128xf32> to vector<1x128xf32>
    %cst_35 = arith.constant 0.000000e+00 : f32
    %54 = vector.broadcast %cst_35 : f32 to vector<1x128xf32>
    %55 = arith.select %47, %53, %54 : vector<1x128xi1>, vector<1x128xf32>
    %c1_36 = arith.constant 1 : index
    %c2_37 = arith.constant 2 : index
    %c0_38 = arith.constant 0 : index
    %c0_39 = arith.constant 0 : index
    %56 = vector.load %arg2[%c1_36, %c2_37, %c0_38, %c0_39] : memref<2x3x1x128xf32, #tpu.memory_space<vmem>>, vector<1x1x1x128xf32>
    %57 = vector.shape_cast %56 : vector<1x1x1x128xf32> to vector<1x128xf32>
    %cst_40 = arith.constant 0.000000e+00 : f32
    %58 = vector.broadcast %cst_40 : f32 to vector<1x128xf32>
    %59 = arith.select %47, %57, %58 : vector<1x128xi1>, vector<1x128xf32>
    %60 = arith.maximumf %51, %55 : vector<1x128xf32>
    %61 = arith.maximumf %60, %59 : vector<1x128xf32>
    %62 = arith.subf %51, %61 : vector<1x128xf32>
    %63 = math.exp %62 : vector<1x128xf32>
    %64 = arith.subf %55, %61 : vector<1x128xf32>
    %65 = math.exp %64 : vector<1x128xf32>
    %66 = arith.addf %63, %65 : vector<1x128xf32>
    %67 = arith.subf %59, %61 : vector<1x128xf32>
    %68 = math.exp %67 : vector<1x128xf32>
    %69 = arith.addf %66, %68 : vector<1x128xf32>
    %c1_i32_41 = arith.constant 1 : i32
    %70 = vector.broadcast %c1_i32_41 : i32 to vector<1x128xi32>
    %71 = arith.cmpi eq, %45, %70 : vector<1x128xi32>
    %72 = arith.select %71, %55, %51 : vector<1x128xi1>, vector<1x128xf32>
    %c2_i32_42 = arith.constant 2 : i32
    %73 = vector.broadcast %c2_i32_42 : i32 to vector<1x128xi32>
    %74 = arith.cmpi eq, %45, %73 : vector<1x128xi32>
    %75 = arith.select %74, %59, %72 : vector<1x128xi1>, vector<1x128xf32>
    %76 = math.log %69 : vector<1x128xf32>
    %77 = arith.addf %61, %76 : vector<1x128xf32>
    %78 = arith.subf %77, %75 : vector<1x128xf32>
    %cst_43 = arith.constant 0.000000e+00 : f32
    %79 = vector.broadcast %cst_43 : f32 to vector<1x128xf32>
    %80 = arith.select %47, %78, %79 : vector<1x128xi1>, vector<1x128xf32>
    %cst_44 = arith.constant dense<0.000000e+00> : vector<128xf32>
    %81 = vector.multi_reduction <add>, %80, %cst_44 [0] : vector<1x128xf32> to vector<128xf32>
    %82 = vector.shape_cast %81 : vector<128xf32> to vector<1x128xf32>
    %c1_45 = arith.constant 1 : index
    %c0_46 = arith.constant 0 : index
    %c0_47 = arith.constant 0 : index
    %c0_48 = arith.constant 0 : index
    %83 = vector.load %arg4[%c1_45, %c0_46, %c0_47, %c0_48] : memref<2x1x1x128xf32, #tpu.memory_space<vmem>>, vector<1x1x1x128xf32>
    %84 = vector.shape_cast %83 : vector<1x1x1x128xf32> to vector<1x128xf32>
    %85 = vector.shape_cast %82 : vector<1x128xf32> to vector<1x1x1x128xf32>
    tpu.vector_store %arg4[%c1_45, %c0_46, %c0_47, %c0_48], %85 {strides = array<i32>} : memref<2x1x1x128xf32, #tpu.memory_space<vmem>>, vector<1x1x1x128xf32>,
    return
  }
  func.func @transform_0(%arg0: i32, %arg1: i32) -> (i32, i32, i32, i32) {
    %c0_i32 = arith.constant 0 : i32
    %c0_i32_0 = arith.constant 0 : i32
    %c0_i32_1 = arith.constant 0 : i32
    return %arg0, %c0_i32, %arg1, %c0_i32_0 : i32, i32, i32, i32
  }
  func.func @transform_1(%arg0: i32, %arg1: i32) -> (i32, i32, i32, i32) {
    %c0_i32 = arith.constant 0 : i32
    %c0_i32_0 = arith.constant 0 : i32
    %c0_i32_1 = arith.constant 0 : i32
    return %arg0, %c0_i32, %arg1, %c0_i32_0 : i32, i32, i32, i32
  }
  func.func @transform_2(%arg0: i32, %arg1: i32) -> (i32, i32, i32, i32) {
    %c0_i32 = arith.constant 0 : i32
    %c0_i32_0 = arith.constant 0 : i32
    %c0_i32_1 = arith.constant 0 : i32
    return %arg0, %arg1, %c0_i32, %c0_i32_0 : i32, i32, i32, i32
  }
}

</mosaic_0001>

<bundles_post_ra>
// kernel: ocwcce_loss.1
= control target key start
LH: loop header
LB: loop body
LE: loop exit
PB: predicated region body
PF: predicated region fallthrough
CT: control target
= control target key end

     0   :  { %s460_s9 = smov 0   ;;  %s462_s10 = smov 0   ;;  %s527_s0 = inlined_call_operand.vmem [shape: f32[4,3,1,128], index: 0, kind: input, shape index: {}]   ;;  %s528_s1 = inlined_call_operand.vmem [shape: s8[4,1,1,128], index: 1, kind: input, shape index: {}]   ;;  %s529_s2 = inlined_call_operand.vmem [shape: f32[4,1,1,128], index: 2, kind: output, shape index: {}]  }
   0x1   :  { %s464_s11 = smov 0  }
   0x2 LB: > { %s24_s12 = sadd.s32 1, %s439_s10  ;;  %p367_p0 = scmp.ge.s32.totalorder %s443_s11, 1  ;;  %s443_s11 = sphi %s464_s11, %s12_s11   ;;  %s439_s10 = sphi %s462_s10, %s531_s10   ;;  %s435_s9 = sphi %s460_s9, %s530_s9  }
   0x3   : > { %p26_p1 = scmp.ge.s32.totalorder %s24_s12, 2  ;;  %p147_p2 = scmp.lt.s32.totalorder %s443_s11, 3 }
   0x5   : > { %s533_s12 = smov (%p26_p1, %s24_s12), 0  ;;  %p148_p3 = pnand %p367_p0, %p147_p2 }
   0x6   : > { %s368_s13 = sshll.u32 (!%p148_p3), %s435_s9, 1 }
   0x7   : > { %151 = sbr.rel (%p148_p3) target bundleno = 57 (0x39), region = 28  ;;  %p182_p4 = scmp.lt.s32.totalorder (!%p148_p3), %s368_s13, 3 }
   0xc   : > { %s535_s13 = smov (!%p182_p4, %s368_s13), 3 }
   0xd   : > { %s380_s14 = smul.u32 3, %s535_s13  ;;  %s196_s17 = scalar_lea.vmem %s528_s1, %s535_s13 }
   0xe   : > { %v206_v0 = vld [vmem:[%s196_s17] sm:$0x1]  ;;  %v373_v1 = vld [vmem:[%s196_s17 + $0x1] sm:$0x1]  ;;  %s204_s23 = scalar_lea.vmem %s529_s2, %s535_s13 }
   0xf   : > { %s188_s20 = scalar_lea.vmem %s527_s0, %s380_s14  ;;  %v488_v2 = vunpack.c.0.s8 %v206_v0  ;;  %v490_v3 = vunpack.c.0.s8 %v373_v1 }
  0x10   : > { %v209_v4 = vld [vmem:[%s188_s20] sm:$0x1]  ;;  %v371_v5 = vld [vmem:[%s188_s20 + $0x1] sm:$0x1]  ;;  %v372_v6 = vld [vmem:[%s188_s20 + $0x2] sm:$0x1] }
  0x11   : > { %vm208_vm0 = vcmp.ge.s32.totalorder %v488_v2, 0  ;;  %vm244_vm1 = vcmp.ge.s32.totalorder %v490_v3, 0  ;;  %v374_v7 = vld [vmem:[%s188_s20 + $0x3] sm:$0x1]  ;;  %v375_v12 = vld [vmem:[%s188_s20 + $0x4] sm:$0x1] }
  0x12   : > { %v210_v8 = vsel %vm208_vm0, %v209_v4, 0.0  ;;  %v213_v9 = vsel %vm208_vm0, %v371_v5, 0.0  ;;  %v216_v10 = vsel %vm208_vm0, %v372_v6, 0.0  ;;  %v247_v11 = vsel %vm244_vm1, %v374_v7, 0.0  ;;  %v376_v15 = vld [vmem:[%s188_s20 + $0x5] sm:$0x1] }
  0x13   : > { %v217_v13 = vmax.f32 %v210_v8, %v213_v9  ;;  %v250_v14 = vsel %vm244_vm1, %v375_v12, 0.0  ;;  %v253_v16 = vsel %vm244_vm1, %v376_v15, 0.0  ;;  %vm230_vm2 = vcmp.eq.s32.totalorder %v488_v2, 1 }
  0x14   : > { %v254_v17 = vmax.f32 %v247_v11, %v250_v14  ;;  %v231_v42 = vsel %vm230_vm2, %v213_v9, %v210_v8  ;;  %vm232_vm3 = vcmp.eq.s32.totalorder %v488_v2, 2  ;;  %vm267_vm4 = vcmp.eq.s32.totalorder %v490_v3, 1 }
  0x15   : > { %v218_v18 = vmax.f32 %v217_v13, %v216_v10  ;;  %v233_v45 = vsel %vm232_vm3, %v216_v10, %v231_v42  ;;  %v268_v46 = vsel %vm267_vm4, %v250_v14, %v247_v11  ;;  %vm269_vm5 = vcmp.eq.s32.totalorder %v490_v3, 2 }
  0x16   : > { %v255_v19 = vmax.f32 %v254_v17, %v253_v16  ;;  %v270_v51 = vsel %vm269_vm5, %v253_v16, %v268_v46 }
  0x17   : > { %v219_v20 = vsub.f32 %v210_v8, %v218_v18  ;;  %v222_v21 = vsub.f32 %v213_v9, %v218_v18  ;;  %v226_v22 = vsub.f32 %v216_v10, %v218_v18 }
  0x18   : > { %v256_v23 = vsub.f32 %v247_v11, %v255_v19  ;;  %v259_v24 = vsub.f32 %v250_v14, %v255_v19  ;;  %v263_v25 = vsub.f32 %v253_v16, %v255_v19 }
  0x19   : > { %v220_v26 = vmul.f32 1.442695, %v219_v20  ;;  %v223_v27 = vmul.f32 1.442695, %v222_v21  ;;  %v227_v28 = vmul.f32 1.442695, %v226_v22 }
  0x1a   : > { %v257_v29 = vmul.f32 1.442695, %v256_v23  ;;  %v260_v30 = vmul.f32 1.442695, %v259_v24  ;;  %v264_v31 = vmul.f32 1.442695, %v263_v25 }
  0x1b   : > { %405 = vpow2.f32 %v220_v26 }
  0x1c   : > { %407 = vpow2.f32 %v223_v27 }
  0x1d   : > { %409 = vpow2.f32 %v227_v28 }
  0x1e   : > { %411 = vpow2.f32 %v257_v29 }
  0x1f   : > { %413 = vpow2.f32 %v260_v30 }
  0x20   : > { %415 = vpow2.f32 %v264_v31 }
  0x21   : > { %v406_v32 = vpop.eup %405 }
  0x22   : > { %v408_v33 = vpop.eup %407 }
  0x23   : > { %v410_v34 = vpop.eup %409  ;;  %v225_v35 = vadd.f32 %v408_v33, %v406_v32 }
  0x24   : > { %v412_v36 = vpop.eup %411 }
  0x25   : > { %v414_v37 = vpop.eup %413  ;;  %v229_v38 = vadd.f32 %v410_v34, %v225_v35 }
  0x26   : > { %v416_v39 = vpop.eup %415  ;;  %v262_v40 = vadd.f32 %v414_v37, %v412_v36 }
  0x27   : > { %417 = vlog2.f32 %v229_v38 }
  0x28   : > { %v266_v41 = vadd.f32 %v416_v39, %v262_v40 }
  0x2a   : > { %419 = vlog2.f32 %v266_v41 }
  0x2d   : > { %v418_v43 = vpop.eup %417 }
  0x2e   : > { %v235_v44 = vmul.f32 0.6931472, %v418_v43 }
  0x30   : > { %v420_v47 = vpop.eup %419  ;;  %v236_v48 = vadd.f32 %v235_v44, %v218_v18 }
  0x31   : > { %v272_v49 = vmul.f32 0.6931472, %v420_v47 }
  0x32   : > { %v237_v50 = vsub.f32 %v236_v48, %v233_v45 }
  0x33   : > { %v273_v52 = vadd.f32 %v272_v49, %v255_v19 }
  0x34   : > { %v238_v53 = vsel %vm208_vm0, %v237_v50, 0.0 }
  0x35   : > { %240 = vst [vmem:[%s204_s23] sm:$0x1] %v238_v53  ;;  %v274_v54 = vsub.f32 %v273_v52, %v270_v51 }
  0x37   : > { %v275_v55 = vsel %vm244_vm1, %v274_v54, 0.0 }
  0x38   : > { %377 = vst [vmem:[%s204_s23 + $0x1] sm:$0x1] %v275_v55 }
  0x39 PF: > { %s12_s11 = sadd.s32 1, %s443_s11   ;;  %s530_s9 = smov %s439_s10 }
  0x3a   : > { %p9_p5 = scmp.ge.s32.totalorder %s12_s11, 4   ;;  %s531_s10 = smov %s533_s12 }
  0x3c   :  { %11 = sbr.rel (!%p9_p5) target bundleno = 2 (0x2), region = 68 }

</bundles_post_ra>
